<compile_context>
chip_gen: v7x
topology: tpu7x:2x2x1
jax: 0.10.0
libtpu: 0.0.40
codegen_flags: <defaults>
</compile_context>

<pallas_src>
import jax
import jax.numpy as jnp
from jax.experimental import pallas as pl
from jax.experimental.pallas import tpu as pltpu


def _round_up(x, m):
    return (x + m - 1) // m * m


def _pick_tile(n, max_tile=8192, min_steps=8):
    """Lane-dense tile (multiple of 128), clamped so the grid keeps >= min_steps steps
    (>= min_steps/2 per TensorCore on v7x with dimension_semantics=("parallel",))."""
    target = _round_up(max(1, -(-n // min_steps)), 128)
    return max(128, min(max_tile, target))


# ----------------------------------------------------------------------------
# Fused kernel: grid_to_world affine + grid_coord subtract + point-wise MLP,
# channels-first (points on the lane axis).
# ----------------------------------------------------------------------------
def _fused_kernel(mins_ref, vs_ref, org_ref, w1t_ref, b1_ref, w2t_ref, b2_ref,
                  ijk_ref, feat_ref, coord_ref, gridc_ref):
    ijk_i = ijk_ref[...]                                    # (3, tn) int32
    ijk_f = ijk_i.astype(jnp.float32)

    # grid_to_world: ijk * voxel_size + origin  (per-axis, broadcast along lanes)
    coord_ref[...] = ijk_f * vs_ref[...] + org_ref[...]    # (3, tn) f32
    # grid_coord: ijk - global per-axis min
    gridc_ref[...] = ijk_i - mins_ref[...]                  # (3, tn) int32

    # Layer 1 with the affine folded into the weights: h = W1_eff @ ijk_f + b1_eff.
    # K = 3 -> three rank-1 VPU broadcast-MACs instead of a tiny-contraction matmul.
    w1t = w1t_ref[...]                                      # (H, 3) resident
    h = (w1t[:, 0:1] * ijk_f[0:1, :]
         + w1t[:, 1:2] * ijk_f[1:2, :]
         + w1t[:, 2:3] * ijk_f[2:3, :]
         + b1_ref[...])                                     # (H, tn)
    h = jnp.maximum(h, 0.0)

    # Layer 2 on the MXU: (C, H) @ (H, tn)
    feat_ref[...] = (jnp.dot(w2t_ref[...], h, preferred_element_type=jnp.float32)
                     + b2_ref[...])                         # (C, tn)


def fused_encoder(ijk_cf, mins, vs_col, org_col, w1t_eff, b1_eff, w2t, b2_col, tn):
    three, n_pad = ijk_cf.shape
    assert three == 3 and n_pad % tn == 0
    H = w1t_eff.shape[0]
    C = w2t.shape[0]

    out_shapes = (
        jax.ShapeDtypeStruct((C, n_pad), jnp.float32),       # unet_feat (channels-first)
        jax.ShapeDtypeStruct((3, n_pad), jnp.float32),       # coords
        jax.ShapeDtypeStruct((3, n_pad), jnp.int32),         # grid_coord
    )
    return pl.pallas_call(
        _fused_kernel,
        out_shape=out_shapes,
        grid=(n_pad // tn,),
        in_specs=[
            pl.BlockSpec((3, 1), lambda i: (0, 0)),          # mins        (resident)
            pl.BlockSpec((3, 1), lambda i: (0, 0)),          # voxel_size  (resident)
            pl.BlockSpec((3, 1), lambda i: (0, 0)),          # origin      (resident)
            pl.BlockSpec((H, 3), lambda i: (0, 0)),          # w1t_eff     (resident)
            pl.BlockSpec((H, 1), lambda i: (0, 0)),          # b1_eff      (resident)
            pl.BlockSpec((C, H), lambda i: (0, 0)),          # w2t         (resident)
            pl.BlockSpec((C, 1), lambda i: (0, 0)),          # b2          (resident)
            pl.BlockSpec((3, tn), lambda i: (0, i)),         # ijk tile (lane-dense)
        ],
        out_specs=(
            pl.BlockSpec((C, tn), lambda i: (0, i)),
            pl.BlockSpec((3, tn), lambda i: (0, i)),
            pl.BlockSpec((3, tn), lambda i: (0, i)),
        ),
        compiler_params=pltpu.CompilerParams(dimension_semantics=("parallel",)),
    )(mins, vs_col, org_col, w1t_eff, b1_eff, w2t, b2_col, ijk_cf)


# ----------------------------------------------------------------------------
# Encoder forward (glue in plain JAX, hot path in one Pallas kernel)
# ----------------------------------------------------------------------------
def encoder_forward(ijk, voxel_size, origin, offset, params):
    # `offset` is batch metadata consumed only by the real sparse backbone;
    # carried but unused by the point-wise stand-in.
    del offset
    # PyTorch uses .long(); int32 is sufficient for the coordinate ranges used here.
    N = ijk.shape[0]
    H = params["w1"].shape[1]
    C = params["w2"].shape[1]

    # Global per-axis min: 12 B/point reduction -> plain XLA reduce, not a pallas_call.
    mins = jnp.min(ijk, axis=0).reshape(3, 1).astype(jnp.int32)

    # Channels-first, lane-dense point slab (pad the point/lane axis to the tile).
    tn = _pick_tile(N)
    n_pad = _round_up(N, tn)
    ijk_cf = jnp.transpose(ijk)                              # (3, N)
    if n_pad != N:
        ijk_cf = jnp.pad(ijk_cf, ((0, 0), (0, n_pad - N)), mode="edge")

    vs_col = voxel_size.reshape(3, 1).astype(jnp.float32)
    org_col = origin.reshape(3, 1).astype(jnp.float32)

    # Fold grid_to_world into layer 1: h = (ijk*vs + org) @ w1 + b1
    #                                    = ijk @ (diag(vs) @ w1) + (org @ w1 + b1)
    w1 = params["w1"]                                        # (3, H)
    w1t_eff = (w1 * vs_col).T                                # (H, 3)
    b1_eff = (org_col.reshape(1, 3) @ w1 + params["b1"]).reshape(H, 1)
    w2t = params["w2"].T                                     # (C, H)
    b2_col = params["b2"].reshape(C, 1)

    feat_cf, coords_cf, gridc_cf = fused_encoder(
        ijk_cf, mins, vs_col, org_col, w1t_eff, b1_eff, w2t, b2_col, tn)

    # Back to the PyTorch channels-last layout (see TODO at top).
    unet_feat = feat_cf[:, :N].T                             # (N, C)
    coords = coords_cf[:, :N].T                              # (N, 3)
    grid_coord = gridc_cf[:, :N].T                           # (N, 3)
    return unet_feat, coords, grid_coord


# ----------------------------------------------------------------------------
# Main: deterministic synthetic inputs + reference check
# ----------------------------------------------------------------------------
if __name__ == "__main__":
    c_dim, hidden = 32, 32
    N = 1000                     # non-multiple of the tile -> exercises pad/slice path

    key = jax.random.PRNGKey(0)
    k_ijk, k_w1, k_b1, k_w2, k_b2 = jax.random.split(key, 5)

    # synthetic GridBatch: integer voxel coords, voxel size, world origin, batch offsets
    ijk = jax.random.randint(k_ijk, (N, 3), minval=-8, maxval=8, dtype=jnp.int32)
    voxel_size = jnp.array([0.1, 0.1, 0.1], dtype=jnp.float32)     # per-axis voxel size
    origin = jnp.array([-1.0, -1.0, -1.0], dtype=jnp.float32)      # world origin
    offset = jnp.array([N // 2, N], dtype=jnp.int32)               # 2 "batches" of points

    # deterministic stand-in MLP params
    params = {
        "w1": 0.1 * jax.random.normal(k_w1, (3, hidden), dtype=jnp.float32),
        "b1": 0.05 * jax.random.normal(k_b1, (1, hidden), dtype=jnp.float32),
        "w2": 0.1 * jax.random.normal(k_w2, (hidden, c_dim), dtype=jnp.float32),
        "b2": 0.05 * jax.random.normal(k_b2, (1, c_dim), dtype=jnp.float32),
    }

    unet_feat, coords, grid_coord = jax.block_until_ready(
        jax.jit(encoder_forward)(ijk, voxel_size, origin, offset, params))

    # pure-JAX reference
    coords_ref = ijk.astype(jnp.float32) * voxel_size[None, :] + origin[None, :]
    gridc_ref = ijk - jnp.min(ijk, axis=0, keepdims=True)
    h_ref = jnp.maximum(coords_ref @ params["w1"] + params["b1"], 0.0)
    feat_ref = h_ref @ params["w2"] + params["b2"]

    assert unet_feat.shape == (N, c_dim) and unet_feat.dtype == jnp.float32
    assert coords.shape == (N, 3) and grid_coord.shape == (N, 3)
    assert grid_coord.dtype == jnp.int32
    assert jnp.array_equal(grid_coord, gridc_ref)
    assert jnp.allclose(coords, coords_ref, atol=1e-5, rtol=1e-5)
    assert jnp.allclose(unet_feat, feat_ref, atol=1e-4, rtol=1e-4)

    print("KERNEL_OK")
</pallas_src>

<mosaic_0001>
module attributes {stable_mosaic.version = 11 : i64} {
  func.func @_fused_kernel(%arg0: i32, %arg1: memref<3x1xi32, #tpu.memory_space<vmem>>, %arg2: memref<3x1xf32, #tpu.memory_space<vmem>>, %arg3: memref<3x1xf32, #tpu.memory_space<vmem>>, %arg4: memref<32x3xf32, #tpu.memory_space<vmem>>, %arg5: memref<32x1xf32, #tpu.memory_space<vmem>>, %arg6: memref<32x32xf32, #tpu.memory_space<vmem>>, %arg7: memref<32x1xf32, #tpu.memory_space<vmem>>, %arg8: memref<3x128xi32, #tpu.memory_space<vmem>>, %arg9: memref<32x128xf32, #tpu.memory_space<vmem>>, %arg10: memref<3x128xf32, #tpu.memory_space<vmem>>, %arg11: memref<3x128xi32, #tpu.memory_space<vmem>>) attributes {dimension_semantics = [#tpu.dimension_semantics<parallel>], iteration_bounds = array<i64: 8>, scalar_prefetch = 0 : i64, scratch_operands = 0 : i64, tpu.core_type = #tpu.core_type<tc>, window_params = [{pipeline_mode = #tpu.pipeline_mode<synchronous>, transform_indices = @transform_0, window_bounds = array<i64: 3, 1>}, {pipeline_mode = #tpu.pipeline_mode<synchronous>, transform_indices = @transform_1, window_bounds = array<i64: 3, 1>}, {pipeline_mode = #tpu.pipeline_mode<synchronous>, transform_indices = @transform_2, window_bounds = array<i64: 3, 1>}, {pipeline_mode = #tpu.pipeline_mode<synchronous>, transform_indices = @transform_3, window_bounds = array<i64: 32, 3>}, {pipeline_mode = #tpu.pipeline_mode<synchronous>, transform_indices = @transform_4, window_bounds = array<i64: 32, 1>}, {pipeline_mode = #tpu.pipeline_mode<synchronous>, transform_indices = @transform_5, window_bounds = array<i64: 32, 32>}, {pipeline_mode = #tpu.pipeline_mode<synchronous>, transform_indices = @transform_6, window_bounds = array<i64: 32, 1>}, {transform_indices = @transform_7, window_bounds = array<i64: 3, 128>}, {transform_indices = @transform_8, window_bounds = array<i64: 32, 128>}, {transform_indices = @transform_9, window_bounds = array<i64: 3, 128>}, {transform_indices = @transform_10, window_bounds = array<i64: 3, 128>}]} {
    %c0 = arith.constant 0 : index
    %c0_0 = arith.constant 0 : index
    %0 = vector.load %arg8[%c0, %c0_0] : memref<3x128xi32, #tpu.memory_space<vmem>>, vector<3x128xi32>
    %1 = arith.sitofp %0 : vector<3x128xi32> to vector<3x128xf32>
    %c0_1 = arith.constant 0 : index
    %c0_2 = arith.constant 0 : index
    %2 = vector.load %arg2[%c0_1, %c0_2] : memref<3x1xf32, #tpu.memory_space<vmem>>, vector<3x1xf32>
    %3 = vector.broadcast %2 : vector<3x1xf32> to vector<3x128xf32>
    %4 = arith.mulf %1, %3 : vector<3x128xf32>
    %c0_3 = arith.constant 0 : index
    %c0_4 = arith.constant 0 : index
    %5 = vector.load %arg3[%c0_3, %c0_4] : memref<3x1xf32, #tpu.memory_space<vmem>>, vector<3x1xf32>
    %6 = vector.broadcast %5 : vector<3x1xf32> to vector<3x128xf32>
    %7 = arith.addf %4, %6 : vector<3x128xf32>
    %c0_5 = arith.constant 0 : index
    %c0_6 = arith.constant 0 : index
    %8 = vector.load %arg10[%c0_5, %c0_6] : memref<3x128xf32, #tpu.memory_space<vmem>>, vector<3x128xf32>
    tpu.vector_store %arg10[%c0_5, %c0_6], %7 {strides = array<i32>} : memref<3x128xf32, #tpu.memory_space<vmem>>, vector<3x128xf32>,
    %c0_7 = arith.constant 0 : index
    %c0_8 = arith.constant 0 : index
    %9 = vector.load %arg1[%c0_7, %c0_8] : memref<3x1xi32, #tpu.memory_space<vmem>>, vector<3x1xi32>
    %10 = vector.broadcast %9 : vector<3x1xi32> to vector<3x128xi32>
    %11 = arith.subi %0, %10 : vector<3x128xi32>
    %c0_9 = arith.constant 0 : index
    %c0_10 = arith.constant 0 : index
    %12 = vector.load %arg11[%c0_9, %c0_10] : memref<3x128xi32, #tpu.memory_space<vmem>>, vector<3x128xi32>
    tpu.vector_store %arg11[%c0_9, %c0_10], %11 {strides = array<i32>} : memref<3x128xi32, #tpu.memory_space<vmem>>, vector<3x128xi32>,
    %c0_11 = arith.constant 0 : index
    %c0_12 = arith.constant 0 : index
    %13 = vector.load %arg4[%c0_11, %c0_12] : memref<32x3xf32, #tpu.memory_space<vmem>>, vector<32x3xf32>
    %14 = vector.extract_strided_slice %13 {offsets = [0, 0], sizes = [32, 1], strides = [1, 1]} : vector<32x3xf32> to vector<32x1xf32>
    %15 = vector.extract_strided_slice %1 {offsets = [0, 0], sizes = [1, 128], strides = [1, 1]} : vector<3x128xf32> to vector<1x128xf32>
    %16 = vector.broadcast %14 : vector<32x1xf32> to vector<32x128xf32>
    %17 = vector.broadcast %15 : vector<1x128xf32> to vector<32x128xf32>
    %18 = arith.mulf %16, %17 : vector<32x128xf32>
    %19 = vector.extract_strided_slice %13 {offsets = [0, 1], sizes = [32, 1], strides = [1, 1]} : vector<32x3xf32> to vector<32x1xf32>
    %20 = vector.extract_strided_slice %1 {offsets = [1, 0], sizes = [1, 128], strides = [1, 1]} : vector<3x128xf32> to vector<1x128xf32>
    %21 = vector.broadcast %19 : vector<32x1xf32> to vector<32x128xf32>
    %22 = vector.broadcast %20 : vector<1x128xf32> to vector<32x128xf32>
    %23 = arith.mulf %21, %22 : vector<32x128xf32>
    %24 = arith.addf %18, %23 : vector<32x128xf32>
    %25 = vector.extract_strided_slice %13 {offsets = [0, 2], sizes = [32, 1], strides = [1, 1]} : vector<32x3xf32> to vector<32x1xf32>
    %26 = vector.extract_strided_slice %1 {offsets = [2, 0], sizes = [1, 128], strides = [1, 1]} : vector<3x128xf32> to vector<1x128xf32>
    %27 = vector.broadcast %25 : vector<32x1xf32> to vector<32x128xf32>
    %28 = vector.broadcast %26 : vector<1x128xf32> to vector<32x128xf32>
    %29 = arith.mulf %27, %28 : vector<32x128xf32>
    %30 = arith.addf %24, %29 : vector<32x128xf32>
    %c0_13 = arith.constant 0 : index
    %c0_14 = arith.constant 0 : index
    %31 = vector.load %arg5[%c0_13, %c0_14] : memref<32x1xf32, #tpu.memory_space<vmem>>, vector<32x1xf32>
    %32 = vector.broadcast %31 : vector<32x1xf32> to vector<32x128xf32>
    %33 = arith.addf %30, %32 : vector<32x128xf32>
    %cst = arith.constant 0.000000e+00 : f32
    %34 = vector.broadcast %cst : f32 to vector<32x128xf32>
    %35 = arith.maximumf %33, %34 : vector<32x128xf32>
    %c0_15 = arith.constant 0 : index
    %c0_16 = arith.constant 0 : index
    %36 = vector.load %arg6[%c0_15, %c0_16] : memref<32x32xf32, #tpu.memory_space<vmem>>, vector<32x32xf32>
    %cst_17 = arith.constant dense<0.000000e+00> : vector<32x128xf32>
    %37 = tpu.matmul %36, %35, %cst_17 {dimension_numbers = #tpu.dot_dimension_numbers<[1], [0], [0], [1], [0, 0, 1, 1], [], []>} : vector<32x32xf32>, vector<32x128xf32>, vector<32x128xf32> -> vector<32x128xf32>
    %c0_18 = arith.constant 0 : index
    %c0_19 = arith.constant 0 : index
    %38 = vector.load %arg7[%c0_18, %c0_19] : memref<32x1xf32, #tpu.memory_space<vmem>>, vector<32x1xf32>
    %39 = vector.broadcast %38 : vector<32x1xf32> to vector<32x128xf32>
    %40 = arith.addf %37, %39 : vector<32x128xf32>
    %c0_20 = arith.constant 0 : index
    %c0_21 = arith.constant 0 : index
    %41 = vector.load %arg9[%c0_20, %c0_21] : memref<32x128xf32, #tpu.memory_space<vmem>>, vector<32x128xf32>
    tpu.vector_store %arg9[%c0_20, %c0_21], %40 {strides = array<i32>} : memref<32x128xf32, #tpu.memory_space<vmem>>, vector<32x128xf32>,
    return
  }
  func.func @transform_0(%arg0: i32) -> (i32, i32) {
    %c0_i32 = arith.constant 0 : i32
    %c0_i32_0 = arith.constant 0 : i32
    %c0_i32_1 = arith.constant 0 : i32
    return %c0_i32, %c0_i32_0 : i32, i32
  }
  func.func @transform_1(%arg0: i32) -> (i32, i32) {
    %c0_i32 = arith.constant 0 : i32
    %c0_i32_0 = arith.constant 0 : i32
    %c0_i32_1 = arith.constant 0 : i32
    return %c0_i32, %c0_i32_0 : i32, i32
  }
  func.func @transform_2(%arg0: i32) -> (i32, i32) {
    %c0_i32 = arith.constant 0 : i32
    %c0_i32_0 = arith.constant 0 : i32
    %c0_i32_1 = arith.constant 0 : i32
    return %c0_i32, %c0_i32_0 : i32, i32
  }
  func.func @transform_3(%arg0: i32) -> (i32, i32) {
    %c0_i32 = arith.constant 0 : i32
    %c0_i32_0 = arith.constant 0 : i32
    %c0_i32_1 = arith.constant 0 : i32
    return %c0_i32, %c0_i32_0 : i32, i32
  }
  func.func @transform_4(%arg0: i32) -> (i32, i32) {
    %c0_i32 = arith.constant 0 : i32
    %c0_i32_0 = arith.constant 0 : i32
    %c0_i32_1 = arith.constant 0 : i32
    return %c0_i32, %c0_i32_0 : i32, i32
  }
  func.func @transform_5(%arg0: i32) -> (i32, i32) {
    %c0_i32 = arith.constant 0 : i32
    %c0_i32_0 = arith.constant 0 : i32
    %c0_i32_1 = arith.constant 0 : i32
    return %c0_i32, %c0_i32_0 : i32, i32
  }
  func.func @transform_6(%arg0: i32) -> (i32, i32) {
    %c0_i32 = arith.constant 0 : i32
    %c0_i32_0 = arith.constant 0 : i32
    %c0_i32_1 = arith.constant 0 : i32
    return %c0_i32, %c0_i32_0 : i32, i32
  }
  func.func @transform_7(%arg0: i32) -> (i32, i32) {
    %c0_i32 = arith.constant 0 : i32
    %c0_i32_0 = arith.constant 0 : i32
    return %c0_i32, %arg0 : i32, i32
  }
  func.func @transform_8(%arg0: i32) -> (i32, i32) {
    %c0_i32 = arith.constant 0 : i32
    %c0_i32_0 = arith.constant 0 : i32
    return %c0_i32, %arg0 : i32, i32
  }
  func.func @transform_9(%arg0: i32) -> (i32, i32) {
    %c0_i32 = arith.constant 0 : i32
    %c0_i32_0 = arith.constant 0 : i32
    return %c0_i32, %arg0 : i32, i32
  }
  func.func @transform_10(%arg0: i32) -> (i32, i32) {
    %c0_i32 = arith.constant 0 : i32
    %c0_i32_0 = arith.constant 0 : i32
    return %c0_i32, %arg0 : i32, i32
  }
}

</mosaic_0001>

<bundles_post_ra>
// kernel: encoder_forward.1
= control target key start
LH: loop header
LB: loop body
LE: loop exit
PB: predicated region body
PF: predicated region fallthrough
CT: control target
= control target key end

     0   :  { %s978_s13 = smov 0   ;;  %s980_s14 = smov 0   ;;  %s1101_s0 = inlined_call_operand.vmem [shape: s32[3,1], index: 0, kind: input, shape index: {}]   ;;  %s1102_s1 = inlined_call_operand.vmem [shape: f32[3,1], index: 1, kind: input, shape index: {}]   ;;  %s1103_s2 = inlined_call_operand.vmem [shape: f32[3,1], index: 2, kind: input, shape index: {}]   ;;  %s1104_s3 = inlined_call_operand.vmem [shape: f32[32,3], index: 3, kind: input, shape index: {}]   ;;  %s1105_s4 = inlined_call_operand.vmem [shape: f32[32,1], index: 4, kind: input, shape index: {}]   ;;  %s1106_s5 = inlined_call_operand.vmem [shape: f32[32,32], index: 5, kind: input, shape index: {}]   ;;  %s1107_s6 = inlined_call_operand.vmem [shape: f32[32,1], index: 6, kind: input, shape index: {}]   ;;  %s1108_s7 = inlined_call_operand.vmem [shape: s32[3,1024], index: 7, kind: input, shape index: {}]   ;;  %s1109_s8 = inlined_call_operand.vmem [shape: f32[32,1024], index: 8, kind: output, shape index: {0}]   ;;  %s1110_s9 = inlined_call_operand.vmem [shape: f32[3,1024], index: 9, kind: output, shape index: {1}]   ;;  %s1111_s10 = inlined_call_operand.vmem [shape: s32[3,1024], index: 10, kind: output, shape index: {2}]  }
   0x1   :  { %s982_s15 = smov 0  }
   0x2 LB: > { %s991_s16 = sadd.s32 4294967295, %s918_s15   ;;  %s993_s17 = sadd.s32 1, %s918_s15   ;;  %s918_s15 = sphi %s982_s15, %s1115_s15   ;;  %s914_s14 = sphi %s980_s14, %s1114_s14   ;;  %s910_s13 = sphi %s978_s13, %s1113_s13  }
   0x3   : > { %s198_s18 = ssub.s32 %s918_s15, %s993_s17  ;;  %s201_s19 = sadd.s32 1, %s914_s14 }
   0x4   : > { %p199_p0 = scmp.eq.s32.totalorder %s198_s18, 0  ;;  %p211_p1 = scmp.ne.s32.totalorder %s914_s14, %s910_s13 }
   0x5   : > { %p212_p2 = scmp.eq.s32.totalorder %s991_s16, 7  ;;  %p814_p3 = scmp.ge.s32.totalorder %s918_s15, 1 }
   0x6   : > { %s1001_s20 = scalar_select %p199_p0, %s914_s14, %s201_s19  }
   0x7   : > { %p1003_p4 = por %p212_p2, %p211_p1  ;;  %p316_p5 = scmp.lt.s32.totalorder %s918_s15, 9 }
   0x9   : > { %p317_p6 = pnand %p814_p3, %p316_p5 }
   0xa   : > { %v395_v0 = vld [vmem:[%s1104_s3] sm:$0xff] (!%p317_p6)  ;;  %v920_v1 = vmov (!%p317_p6), 2   ;;  %v921_v2 = vmov (!%p317_p6), 1   ;;  %v397_v3 = vld [vmem:[%s1104_s3 + $0x10] sm:$0xff] (!%p317_p6)  ;;  %v396_v4 = vld [vmem:[%s1104_s3 + $0x8] sm:$0xff] (!%p317_p6)  ;;  %v922_v5 = vmov (!%p317_p6), 0   ;;  %v419_v26 = vlaneseq (!%p317_p6) }
   0xb   : > { %320 = sbr.rel (%p317_p6) target bundleno = 415 (0x19f), region = 52  ;;  %889 = vset.pattern.permute.xlu0 (!%p317_p6), %v920_v1  ;;  %888 = vset.pattern.permute.xlu1 (!%p317_p6), %v921_v2  ;;  %v398_v6 = vld [vmem:[%s1104_s3 + $0x18] sm:$0xff] (!%p317_p6)  ;;  %v484_v7 = vld [vmem:[%s1105_s4 + $0x8] sm:$0xff] (!%p317_p6)  ;;  %v374_v8 = vld [vmem:[%s1102_s1] sm:$0x7] (!%p317_p6)  ;;  %vm543_vm0 = vcmask (!%p317_p6), 261120  }
   0xc   : > { %456 = vperm.xlu0 (!%p317_p6), %889, %v395_v0   ;;  %428 = vperm.xlu1 (!%p317_p6), %888, %v395_v0   ;;  %v389_v9 = vld [vmem:[%s1101_s0] sm:$0x7] (!%p317_p6)  ;;  %v520_v11 = vld [vmem:[%s1107_s6 + $0x8] sm:$0xff] (!%p317_p6)  ;;  %v485_v12 = vld [vmem:[%s1105_s4 + $0x10] sm:$0xff] (!%p317_p6)  ;;  %p360_p7 = scmp.lt.s32.totalorder (!%p317_p6), %s991_s16, 7  ;;  %v420_v28 = vshrl.u32 (!%p317_p6), %v419_v26, 7 }
   0xd   : > { %v483_v10 = vld [vmem:[%s1105_s4] sm:$0xff] (!%p317_p6)  ;;  %v522_v13 = vld [vmem:[%s1107_s6 + $0x18] sm:$0xff] (!%p317_p6)  ;;  %v517_v18 = vld [vmem:[%s1106_s5 + $0x10] sm:$0xff] (!%p317_p6) }
   0xe   : > { %v486_v14 = vld [vmem:[%s1105_s4 + $0x18] sm:$0xff] (!%p317_p6)  ;;  %v381_v15 = vld [vmem:[%s1103_s2] sm:$0x7] (!%p317_p6)  ;;  %v521_v19 = vld [vmem:[%s1107_s6 + $0x10] sm:$0xff] (!%p317_p6)  ;;  %846 = vmatprep.mubr.msk.f32.mxu1 (!%p317_p6), %vm543_vm0, %v517_v18  ;;  %v421_v31 = vsub.s32 (!%p317_p6), 0, %v420_v28  ;;  %v445_v33 = vsub.s32 (!%p317_p6), 1, %v420_v28 }
   0xf   : > { %v519_v16 = vld [vmem:[%s1107_s6] sm:$0xff] (!%p317_p6)  ;;  %v473_v36 = vsub.s32 (!%p317_p6), 2, %v420_v28  ;;  %v516_v18 = vld [vmem:[%s1106_s5 + $0x8] sm:$0xff] (!%p317_p6) }
  0x10   : > { %464 = vperm.xlu0 (!%p317_p6), %889, %v397_v3   ;;  %432 = vperm.xlu1 (!%p317_p6), %888, %v396_v4   ;;  %v515_v17 = vld [vmem:[%s1106_s5] sm:$0xff] (!%p317_p6) }
  0x11   : > { %843 = vmatprep.mubr.msk.f32.mxu0 (!%p317_p6), %vm543_vm0, %v515_v17 }
  0x12   : > { %s361_s28 = scalar_select %p360_p7, %s991_s16, 7 }
  0x14   : > { %890 = vset.pattern.permute.xlu1 %v920_v1  ;;  %893 = vset.pattern.permute.xlu0 %v922_v5  ;;  %s1062_s29 = sshll.u32 %s361_s28, 2 }
  0x15   : > { %460 = vperm.xlu1 %890, %v396_v4   ;;  %401 = vperm.xlu0 %893, %v395_v0   ;;  %s363_s12 = scalar_lea.vmem %s1108_s7, %s1062_s29  ;;  %s371_s19 = scalar_lea.vmem %s1111_s10, %s1062_s29 }
  0x16   : > { %v372_v30 = vld [vmem:[%s363_s12] sm:$0x7]  ;;  %s367_s24 = scalar_lea.vmem %s1110_s9, %s1062_s29  ;;  %s345_s29 = sand.u32 1, %s910_s13  }
  0x17   : > { %v373_v34 = vcvt.s32.f32 %v372_v30  ;;  %s815_s30 = sshll.u32 %s345_s29, 5  ;;  %s824_s13 = sshll.u32 (%p1003_p4), %s991_s16, 3 }
  0x18   : > { %s347_s11 = scalar_lea.vmem [#allocation2], %s815_s30  ;;  %s661_s18 = scalar_lea.vmem (%p1003_p4), %s1109_s8, %s824_s13 }
  0x19   : > { %406 = vperm.xlu0 %893, %v396_v4   ;;  %891 = vset.pattern.permute.xlu1 %v922_v5  ;;  %v422_v37 = vrot.slane %v373_v34, %v421_v31  ;;  %v446_v39 = vrot.slane %v373_v34, %v445_v33  ;;  %v474_v42 = vrot.slane %v373_v34, %v473_v36 }
  0x1a   : > { %411 = vperm.xlu1 %891, %v397_v3  }
  0x1d   : > { %416 = vperm.xlu0 %893, %v398_v6  }
  0x1e   : > { %892 = vset.pattern.permute.xlu1 %v921_v2 }
  0x1f   : > { %436 = vperm.xlu1 %892, %v397_v3  }
  0x21   : > { %494 = vperm.xlu0 %893, %v484_v7  }
  0x23   : > { %440 = vperm.xlu1 %892, %v398_v6  }
  0x25   : > { %377 = vperm.xlu0 %893, %v374_v8  }
  0x27   : > { %894 = vset.pattern.permute.xlu1 %v920_v1 }
  0x28   : > { %468 = vperm.xlu1 %894, %v398_v6  }
  0x29   : > { %391 = vperm.xlu0 %893, %v389_v9  }
  0x2c   : > { %895 = vset.pattern.permute.xlu1 %v922_v5 }
  0x2d   : > { %489 = vperm.xlu1 %895, %v483_v10   ;;  %530 = vperm.xlu0 %893, %v520_v11  }
  0x31   : > { %499 = vperm.xlu1 %895, %v485_v12   ;;  %540 = vperm.xlu0 %893, %v522_v13  }
  0x35   : > { %504 = vperm.xlu1 %895, %v486_v14  }
  0x39   : > { %384 = vperm.xlu1 %895, %v381_v15  }
  0x3d   : > { %525 = vperm.xlu1 %895, %v519_v16  }
  0x41   : > { %535 = vperm.xlu1 %895, %v521_v19   ;;  %v518_v19 = vld [vmem:[%s1106_s5 + $0x18] sm:$0xff] }
  0x8b   : > { %v429_v20 = vpop.permute.xlu1 %428  ;;  %v457_v21 = vpop.permute.xlu0 %456 }
  0x8c   : > { %v447_v46 = vmul.f32 %v446_v39, %v429_v20  ;;  %v475_v48 = vmul.f32 %v474_v42, %v457_v21 }
  0x8f   : > { %v433_v22 = vpop.permute.xlu1 %432  ;;  %v465_v23 = vpop.permute.xlu0 %464 }
  0x90   : > { %v448_v43 = vmul.f32 %v446_v39, %v433_v22  ;;  %v477_v0 = vmul.f32 %v474_v42, %v465_v23 }
  0x94   : > { %v461_v24 = vpop.permute.xlu1 %460  ;;  %v402_v25 = vpop.permute.xlu0 %401 }
  0x95   : > { %v423_v44 = vmul.f32 %v422_v37, %v402_v25  ;;  %v476_v49 = vmul.f32 %v474_v42, %v461_v24 }
  0x97   : > { %v451_v50 = vadd.f32 %v447_v46, %v423_v44 }
  0x98   : > { %v407_v27 = vpop.permute.xlu0 %406 }
  0x99   : > { %v412_v29 = vpop.permute.xlu1 %411  ;;  %v424_v40 = vmul.f32 %v422_v37, %v407_v27  ;;  %v479_v58 = vadd.f32 %v475_v48, %v451_v50 }
  0x9a   : > { %v425_v56 = vmul.f32 %v422_v37, %v412_v29 }
  0x9b   : > { %v452_v47 = vadd.f32 %v448_v43, %v424_v40 }
  0x9c   : > { %v417_v32 = vpop.permute.xlu0 %416 }
  0x9d   : > { %v480_v54 = vadd.f32 %v476_v49, %v452_v47  ;;  %v426_v60 = vmul.f32 %v422_v37, %v417_v32 }
  0x9e   : > { %v437_v35 = vpop.permute.xlu1 %436 }
  0x9f   : > { %v449_v53 = vmul.f32 %v446_v39, %v437_v35 }
  0xa0   : > { %v495_v38 = vpop.permute.xlu0 %494 }
  0xa1   : > { %v508_v57 = vadd.f32 %v495_v38, %v480_v54  ;;  %v453_v61 = vadd.f32 %v449_v53, %v425_v56 }
  0xa2   : > { %v441_v41 = vpop.permute.xlu1 %440 }
  0xa3   : > { %v450_v62 = vmul.f32 %v446_v39, %v441_v41  ;;  %v512_v1 = vmax.f32 %v508_v57, 0.0  ;;  %v481_v7 = vadd.f32 %v477_v0, %v453_v61 }
  0xa4   : > { %v378_v45 = vpop.permute.xlu0 %377 }
  0xa5   : > { %v454_v5 = vadd.f32 %v450_v62, %v426_v60  ;;  %v380_v12 = vmul.f32 %v378_v45, %v373_v34 }
  0xa7   : > { %v469_v51 = vpop.permute.xlu1 %468 }
  0xa8   : > { %v392_v52 = vpop.permute.xlu0 %391  ;;  %v478_v2 = vmul.f32 %v474_v42, %v469_v51 }
  0xa9   : > { %v393_v55 = vsub.s32 %v372_v30, %v392_v52 }
  0xaa   : > { %v482_v9 = vadd.f32 %v478_v2, %v454_v5 }
  0xab   : > { %394 = vst [vmem:[%s371_s19] sm:$0x7] %v393_v55 }
  0xac   : > { %v490_v59 = vpop.permute.xlu1 %489  ;;  %v531_v20 = vpop.permute.xlu0 %530 }
  0xad   : > { %v507_v63 = vadd.f32 %v490_v59, %v479_v58 }
  0xaf   : > { %v511_v3 = vmax.f32 %v507_v63, 0.0 }
  0xb0   : > { %v500_v4 = vpop.permute.xlu1 %499  ;;  %v541_v22 = vpop.permute.xlu0 %540 }
  0xb1   : > { %v849_v6 = vpack.c.bf16 %v512_v1, %v511_v3  ;;  %v509_v8 = vadd.f32 %v500_v4, %v481_v7 }
  0xb3   : > { %850 = vmatprep.subr.bf16.mxu0 %v849_v6  ;;  %857 = vmatprep.subr.bf16.mxu1 %v849_v6  ;;  %v513_v13 = vmax.f32 %v509_v8, 0.0 }
  0xb4   : > { %v505_v10 = vpop.permute.xlu1 %504  ;;  %852 = vmatpush3.bf16.msra.mxu0 %v849_v6  ;;  %859 = vmatpush3.bf16.msra.mxu1 %v849_v6 }
  0xb5   : > { %v510_v11 = vadd.f32 %v505_v10, %v482_v9 }
  0xb7   : > { %v514_v14 = vmax.f32 %v510_v11, 0.0 }
  0xb8   : > { %v385_v15 = vpop.permute.xlu1 %384 }
  0xb9   : > { %v853_v16 = vpack.c.bf16 %v514_v14, %v513_v13  ;;  %v387_v17 = vadd.f32 %v385_v15, %v380_v12 }
  0xbb   : > { %388 = vst [vmem:[%s367_s24] sm:$0x7] %v387_v17  ;;  %854 = vmatprep.subr.bf16.mxu0 %v853_v16  ;;  %858 = vmatprep.subr.bf16.mxu1 %v853_v16 }
  0xbc   : > { %856 = vmatpush3.bf16.msra.mxu0 %v853_v16  ;;  %860 = vmatpush3.bf16.msra.mxu1 %v853_v16  ;;  %v526_v21 = vpop.permute.xlu1 %525 }
  0xbf   : > { %844 = vmatmul.mubr.msk.f32.vlgmr.msra.gmra.mrb[0].mxu0 %vm543_vm0, %v516_v18  ;;  %847 = vmatmul.mubr.msk.f32.vlgmr.msra.gmra.mrb[0].mxu1 %vm543_vm0, %v518_v19 }
  0xc0   : > { %v536_v23 = vpop.permute.xlu1 %535 }
 0x190   : > { %659 = sbr.rel (!%p1003_p4) target bundleno = 415 (0x19f), region = 56 }
 0x192   : > { %v845_v24 = vpop.f32.mrb[0].mxu0  ;;  %v848_v25 = vpop.f32.mrb[0].mxu1 }
 0x193   : > { %v628_v26 = vadd.f32 %v845_v24, %v531_v20  ;;  %v638_v27 = vadd.f32 %v848_v25, %v541_v22  ;;  %v622_v28 = vpop.f32.mrb[1].mxu0  ;;  %v632_v29 = vpop.f32.mrb[1].mxu1 }
 0x194   : > { %v623_v30 = vadd.f32 %v622_v28, %v526_v21  ;;  %v633_v31 = vadd.f32 %v632_v29, %v536_v23 }
 0x195   : > { %642 = vst [vmem:[%s347_s11 + $0x8] sm:$0xff] %v628_v26  ;;  %644 = vst [vmem:[%s347_s11 + $0x18] sm:$0xff] %v638_v27 }
 0x196   : > { %641 = vst [vmem:[%s347_s11] sm:$0xff] %v623_v30  ;;  %643 = vst [vmem:[%s347_s11 + $0x10] sm:$0xff] %v633_v31 }
 0x19c   : > { %v697_v33 = vld [vmem:[%s347_s11 + $0x8] sm:$0xff]  ;;  %v701_v35 = vld [vmem:[%s347_s11 + $0x18] sm:$0xff] }
 0x19d   : > { %v695_v32 = vld [vmem:[%s347_s11] sm:$0xff]  ;;  %v699_v34 = vld [vmem:[%s347_s11 + $0x10] sm:$0xff]  ;;  %698 = vst [vmem:[%s661_s18 + $0x40] sm:$0xff] %v697_v33  ;;  %702 = vst [vmem:[%s661_s18 + $0xc0] sm:$0xff] %v701_v35 }
 0x19e   : > { %696 = vst [vmem:[%s661_s18] sm:$0xff] %v695_v32  ;;  %700 = vst [vmem:[%s661_s18 + $0x80] sm:$0xff] %v699_v34 }
 0x19f PF: > { %p18_p8 = scmp.ge.s32.totalorder %s993_s17, 10   ;;  %s1113_s13 = smov %s914_s14 }
 0x1a0   : > { %s1114_s14 = smov %s1001_s20  ;;  %s1115_s15 = smov %s993_s17 }
 0x1a1   :  { %20 = sbr.rel (!%p18_p8) target bundleno = 2 (0x2), region = 144 }

</bundles_post_ra>
